<compile_context>
chip_gen: v7x
topology: tpu7x:2x2x1
jax: 0.10.0
libtpu: 0.0.40
codegen_flags: <defaults>
</compile_context>

<pallas_src>
import functools

import jax
import jax.numpy as jnp
from jax.experimental import pallas as pl
from jax.experimental.pallas import tpu as pltpu

_MAX_TILE = 1024  # node-dimension tile upper bound (review: 1024 fits v5e)


def _round_up(x, m):
    return (x + m - 1) // m * m


def _pad2(m, r, c, dtype=jnp.float32):
    out = jnp.zeros((r, c), jnp.float32).at[:m.shape[0], :m.shape[1]].set(m)
    return out.astype(dtype)


# ---------------------------------------------------------------------------
# Kernel 1: one GINConv layer
#   grid = (row tiles "parallel", banded adjacency-column tiles "arbitrary");
#   accumulate (A+I)@h in an f32 VMEM scratch, apply the (BN-folded) 2-layer
#   MLP at the last reduction step (matmul pattern P1+P3).
# ---------------------------------------------------------------------------
def _gin_layer_kernel(lo_ref, hi_ref, a_ref, x_ref, w1_ref, b1_ref, w2_ref,
                      b2_ref, o_ref, acc_ref, *, tile, use_tanh, post_relu):
    i = pl.program_id(0)
    k = pl.program_id(1)

    @pl.when(k == 0)
    def _():
        acc_ref[...] = jnp.zeros_like(acc_ref)

    lo = lo_ref[i]
    hi = hi_ref[i]
    col = jnp.minimum(lo + k, hi)        # column block this step touches
    in_band = (lo + k) <= hi             # steps past this row-tile's band skip

    @pl.when(in_band)
    def _():
        # int8 A tile -> bf16 on the VPU; hidden under the DMA (HBM-bound loop).
        a = a_ref[...].astype(jnp.bfloat16)
        start = pl.multiple_of(col * tile, tile)
        xk = x_ref[pl.ds(start, tile), :]     # h is VMEM-resident (DMA'd once)
        acc_ref[...] += jnp.dot(a, xk, preferred_element_type=jnp.float32)

    @pl.when(k == pl.num_programs(1) - 1)
    def _():
        # MLP: Linear (BN folded, bf16 weights) -> ReLU -> Linear [->Tanh][->ReLU]
        agg = acc_ref[...].astype(jnp.bfloat16)
        z = jnp.dot(agg, w1_ref[...],
                    preferred_element_type=jnp.float32) + b1_ref[...]
        z = jnp.maximum(z, 0.0)
        z = jnp.dot(z.astype(jnp.bfloat16), w2_ref[...],
                    preferred_element_type=jnp.float32) + b2_ref[...]
        if use_tanh:
            z = jnp.tanh(z)
        if post_relu:  # ReLU applied after conv1 / conv2 in forward()
            z = jnp.maximum(z, 0.0)
        o_ref[...] = z.astype(o_ref.dtype)


def gin_layer(lo_blk, hi_blk, band_kt, a_hat, x, w1, b1, w2, b2, *,
              use_tanh, post_relu, tile):
    n_pad = a_hat.shape[0]
    hp = w1.shape[1]
    num_rt = n_pad // tile

    def a_map(i, k, lo, hi):
        return (i, jnp.minimum(lo[i] + k, hi[i]))

    a_spec = pl.BlockSpec((tile, tile), a_map)
    # TODO(synk): add pipeline_mode=pl.Buffered(3) on a_spec if A DMA is still
    # exposed after the int8 shrink.
    x_spec = pl.BlockSpec((n_pad, hp), lambda i, k, lo, hi: (0, 0))  # resident
    w_spec = pl.BlockSpec((hp, hp), lambda i, k, lo, hi: (0, 0))
    b_spec = pl.BlockSpec((1, hp), lambda i, k, lo, hi: (0, 0))
    o_spec = pl.BlockSpec((tile, hp), lambda i, k, lo, hi: (i, 0))

    kern = functools.partial(_gin_layer_kernel, tile=tile, use_tanh=use_tanh,
                             post_relu=post_relu)
    cost = pl.CostEstimate(
        flops=2 * num_rt * band_kt * tile * tile * hp + 4 * n_pad * hp * hp,
        transcendentals=(n_pad * hp if use_tanh else 0),
        bytes_accessed=(num_rt * band_kt * tile * tile      # int8 A tiles
                        + n_pad * hp * 2                    # h streamed once
                        + n_pad * hp * 2                    # bf16 output
                        + 2 * hp * hp * 2 + 2 * hp * 4),    # weights + biases
    )
    return pl.pallas_call(
        kern,
        out_shape=jax.ShapeDtypeStruct((n_pad, hp), jnp.bfloat16),
        grid_spec=pltpu.PrefetchScalarGridSpec(
            num_scalar_prefetch=2,
            grid=(num_rt, band_kt),
            in_specs=[a_spec, x_spec, w_spec, b_spec, w_spec, b_spec],
            out_specs=o_spec,
            scratch_shapes=[pltpu.VMEM((tile, hp), jnp.float32)],
        ),
        compiler_params=pltpu.CompilerParams(
            dimension_semantics=("parallel", "arbitrary")),
        cost_estimate=cost,
    )(lo_blk, hi_blk, a_hat, x, w1, b1, w2, b2)


# ---------------------------------------------------------------------------
# Kernel 2: global mean pool (bf16 matmul, reduced over node tiles)
#           + mol_hidden1 + ReLU + mol_hidden2
# ---------------------------------------------------------------------------
def _readout_kernel(p_ref, x_ref, w1_ref, b1_ref, w2_ref, b2_ref, o_ref,
                    acc_ref):
    k = pl.program_id(0)

    @pl.when(k == 0)
    def _():
        acc_ref[...] = jnp.zeros_like(acc_ref)

    acc_ref[...] += jnp.dot(p_ref[...], x_ref[...],
                            preferred_element_type=jnp.float32)

    @pl.when(k == pl.num_programs(0) - 1)
    def _():
        h = jnp.dot(acc_ref[...].astype(jnp.bfloat16), w1_ref[...],
                    preferred_element_type=jnp.float32) + b1_ref[...]
        h = jnp.maximum(h, 0.0)
        out = jnp.dot(h.astype(jnp.bfloat16), w2_ref[...],
                      preferred_element_type=jnp.float32) + b2_ref[...]
        o_ref[...] = out.astype(o_ref.dtype)


def readout(pool_mat, x, w1, b1, w2, b2, *, tile):
    b_pad, n_pad = pool_mat.shape
    hp = w1.shape[1]
    num_kt = n_pad // tile
    # TODO(synk): fuse this into conv3's finalize (persistent [b_pad, hp]
    # scratch accumulated per row tile) to save one HBM round-trip of h.
    return pl.pallas_call(
        _readout_kernel,
        out_shape=jax.ShapeDtypeStruct((b_pad, hp), jnp.float32),
        grid_spec=pltpu.PrefetchScalarGridSpec(
            num_scalar_prefetch=0,
            grid=(num_kt,),
            in_specs=[pl.BlockSpec((b_pad, tile), lambda k: (0, k)),
                      pl.BlockSpec((tile, hp), lambda k: (k, 0)),
                      pl.BlockSpec((hp, hp), lambda k: (0, 0)),
                      pl.BlockSpec((1, hp), lambda k: (0, 0)),
                      pl.BlockSpec((hp, hp), lambda k: (0, 0)),
                      pl.BlockSpec((1, hp), lambda k: (0, 0))],
            out_specs=pl.BlockSpec((b_pad, hp), lambda k: (0, 0)),
            scratch_shapes=[pltpu.VMEM((b_pad, hp), jnp.float32)],
        ),
        compiler_params=pltpu.CompilerParams(
            dimension_semantics=("arbitrary",)),
    )(pool_mat, x, w1, b1, w2, b2)


# ---------------------------------------------------------------------------
# Host-side parameter prep: fold eval-mode BatchNorm into Linear1, zero-pad
# every feature dimension to a lane-dense 128 multiple, weights in bf16.
# ---------------------------------------------------------------------------
def _fold_and_pad_params(params, hp):
    out = {}
    for name in ("conv1", "conv2", "conv3"):
        p = params[name]
        w1f = p["w1"] * p["bn_scale"]                  # BN scale fold
        b1f = p["b1"] * p["bn_scale"] + p["bn_bias"]   # BN bias fold
        out[name] = {"w1": _pad2(w1f, hp, hp, jnp.bfloat16),
                     "b1": _pad2(b1f, 1, hp),
                     "w2": _pad2(p["w2"], hp, hp, jnp.bfloat16),
                     "b2": _pad2(p["b2"], 1, hp)}
    out["mol_hidden1"] = {
        "w": _pad2(params["mol_hidden1"]["w"], hp, hp, jnp.bfloat16),
        "b": _pad2(params["mol_hidden1"]["b"], 1, hp)}
    out["mol_hidden2"] = {
        "w": _pad2(params["mol_hidden2"]["w"], hp, hp, jnp.bfloat16),
        "b": _pad2(params["mol_hidden2"]["b"], 1, hp)}
    return out


# ---------------------------------------------------------------------------
# Full GraphEncoder forward (glue in plain JAX, compute in Pallas)
# ---------------------------------------------------------------------------
def graph_encoder_forward(params, x, edge_index, batch, num_graphs, *,
                          max_tile=_MAX_TILE):
    n, f = x.shape
    ghc = params["conv1"]["w2"].shape[1]
    nhid = params["mol_hidden1"]["w"].shape[1]
    nout = params["mol_hidden2"]["w"].shape[1]
    hp = _round_up(max(f, ghc, nhid, nout, 1), 128)      # lane-dense width
    tile = min(max_tile, _round_up(n, 128))
    # TODO(synk): on v7x pick tile so n_pad // tile >= 2 so both TCs are used.
    n_pad = _round_up(n, tile)
    num_rt = n_pad // tile

    src = edge_index[0].astype(jnp.int32)
    dst = edge_index[1].astype(jnp.int32)

    # Dense A_hat = A + I stored as int8 (edge counts are small exact ints);
    # cast to bf16 in-kernel right before the MXU dot.
    a = jnp.zeros((n_pad, n_pad), jnp.int32).at[dst, src].add(1)
    diag = jnp.arange(n, dtype=jnp.int32)
    a_hat = a.at[diag, diag].add(1).astype(jnp.int8)
    # TODO(synk): for very large N replace the dense O(N^2) adjacency with a
    # CSR row-gather aggregation kernel (scalar-prefetched neighbour offsets).

    # Per-row-tile nonzero column-block band (edges never cross graphs, so A
    # is block-diagonal).  The diagonal block is always included, keeping the
    # lo <= hi invariant for every row tile that contains real nodes.
    rt = jnp.arange(num_rt, dtype=jnp.int32)
    diag_lo = rt * tile
    diag_hi = jnp.minimum((rt + 1) * tile, n) - 1
    lo_node = diag_lo.at[dst // tile].min(src)
    hi_node = diag_hi.at[dst // tile].max(src)
    lo_blk = (lo_node // tile).astype(jnp.int32)
    hi_blk = (hi_node // tile).astype(jnp.int32)
    band_kt = max(int(jnp.max(hi_blk - lo_blk)) + 1, 1)   # static band length

    # Zero-padded node features (bf16) and mean-pool matrix (bf16).
    x_p = jnp.zeros((n_pad, hp), jnp.float32).at[:n, :f].set(x)
    x_p = x_p.astype(jnp.bfloat16)

    b_pad = _round_up(num_graphs, 8)
    onehot = (batch[None, :] ==
              jnp.arange(num_graphs, dtype=batch.dtype)[:, None]
              ).astype(jnp.float32)
    counts = jnp.maximum(onehot.sum(axis=1, keepdims=True), 1.0)
    pool_mat = jnp.zeros((b_pad, n_pad), jnp.float32).at[
        :num_graphs, :n].set(onehot / counts).astype(jnp.bfloat16)

    pp = _fold_and_pad_params(params, hp)

    h = x_p
    for name, use_tanh, post_relu in (("conv1", False, True),
                                      ("conv2", True, True),
                                      ("conv3", True, False)):
        p = pp[name]
        h = gin_layer(lo_blk, hi_blk, band_kt, a_hat, h, p["w1"], p["b1"],
                      p["w2"], p["b2"], use_tanh=use_tanh,
                      post_relu=post_relu, tile=tile)
        # Dropout(p=0.1) is identity in eval mode.
    # TODO(synk): when int8 A_hat fits VMEM (~9-10K nodes on v6e, ~5-6K on
    # v7x), fuse the three GIN layers + readout into one pallas_call with A
    # and h VMEM-resident to cut the dominant HBM stream ~3x.

    out = readout(pool_mat, h,
                  pp["mol_hidden1"]["w"], pp["mol_hidden1"]["b"],
                  pp["mol_hidden2"]["w"], pp["mol_hidden2"]["b"], tile=tile)
    return out[:num_graphs, :nout]


# ---------------------------------------------------------------------------
# Pure-JAX reference (f32 end-to-end) for a sanity check
# ---------------------------------------------------------------------------
def _reference_forward(params, x, edge_index, batch, num_graphs):
    n = x.shape[0]
    src, dst = edge_index[0], edge_index[1]
    a_hat = (jnp.zeros((n, n), jnp.float32).at[dst, src].add(1.0)
             + jnp.eye(n, dtype=jnp.float32))
    onehot = (batch[None, :] ==
              jnp.arange(num_graphs)[:, None]).astype(jnp.float32)
    pool = onehot / jnp.maximum(onehot.sum(1, keepdims=True), 1.0)
    h = x
    for name, use_tanh, post_relu in (("conv1", False, True),
                                      ("conv2", True, True),
                                      ("conv3", True, False)):
        p = params[name]
        z = a_hat @ h
        z = z @ p["w1"] + p["b1"]
        z = z * p["bn_scale"] + p["bn_bias"]
        z = jnp.maximum(z, 0.0)
        z = z @ p["w2"] + p["b2"]
        if use_tanh:
            z = jnp.tanh(z)
        if post_relu:
            z = jnp.maximum(z, 0.0)
        h = z
    pooled = pool @ h
    hm = jnp.maximum(pooled @ params["mol_hidden1"]["w"]
                     + params["mol_hidden1"]["b"], 0.0)
    return hm @ params["mol_hidden2"]["w"] + params["mol_hidden2"]["b"]


# ---------------------------------------------------------------------------
# Deterministic parameter initialization
# ---------------------------------------------------------------------------
def init_params(key, num_node_features, nout, nhid, graph_hidden_channels):
    ghc = graph_hidden_channels
    ks = jax.random.split(key, 10)
    bn_eps = 1e-5
    # eval-mode BN with running_mean=0, running_var=1, weight=1, bias=0
    bn_scale = jnp.full((1, ghc), 1.0 / jnp.sqrt(1.0 + bn_eps), jnp.float32)
    bn_bias = jnp.zeros((1, ghc), jnp.float32)

    def lin(k, fin, fout):
        scale = 1.0 / jnp.sqrt(fin)
        kw, kb = jax.random.split(k)
        w = jax.random.uniform(kw, (fin, fout), jnp.float32, -scale, scale)
        b = jax.random.uniform(kb, (1, fout), jnp.float32, -scale, scale)
        return w, b

    def gin_params(k1, k2, fin):
        w1, b1 = lin(k1, fin, ghc)
        w2, b2 = lin(k2, ghc, ghc)
        return {"w1": w1, "b1": b1, "bn_scale": bn_scale, "bn_bias": bn_bias,
                "w2": w2, "b2": b2}

    wm1, bm1 = lin(ks[6], ghc, nhid)
    wm2, bm2 = lin(ks[7], nhid, nout)
    return {
        "conv1": gin_params(ks[0], ks[1], num_node_features),
        "conv2": gin_params(ks[2], ks[3], ghc),
        "conv3": gin_params(ks[4], ks[5], ghc),
        "mol_hidden1": {"w": wm1, "b": bm1},
        "mol_hidden2": {"w": wm2, "b": bm2},
    }


if __name__ == "__main__":
    num_node_features = 8
    graph_hidden_channels = 32
    nhid = 32
    nout = 16
    nodes_per_graph = 8
    num_graphs = 2
    n = nodes_per_graph * num_graphs

    key = jax.random.PRNGKey(0)
    k_x, k_p = jax.random.split(key)

    # node features [N, F]
    x = jax.random.normal(k_x, (n, num_node_features), jnp.float32)

    # edge_index [2, E]: a bidirectional ring inside each graph
    srcs, dsts = [], []
    for g in range(num_graphs):
        off = g * nodes_per_graph
        for i in range(nodes_per_graph):
            a_, b_ = off + i, off + (i + 1) % nodes_per_graph
            srcs += [a_, b_]
            dsts += [b_, a_]
    edge_index = jnp.array([srcs, dsts], dtype=jnp.int32)

    # batch assignment vector [N]
    batch = jnp.repeat(jnp.arange(num_graphs, dtype=jnp.int32),
                       nodes_per_graph)

    params = init_params(k_p, num_node_features, nout, nhid,
                         graph_hidden_channels)

    out = graph_encoder_forward(params, x, edge_index, batch, num_graphs)
    out = jax.block_until_ready(out)

    ref = _reference_forward(params, x, edge_index, batch, num_graphs)
    assert out.shape == (num_graphs, nout)
    assert jnp.all(jnp.isfinite(out))
    # bf16 A/h/weight streaming with f32 accumulation => small, bounded drift.
    assert jnp.allclose(out, ref, atol=1e-1, rtol=1e-1), (
        float(jnp.max(jnp.abs(out - ref))))
    print("KERNEL_OK")
</pallas_src>

<mosaic_0001>
module attributes {stable_mosaic.version = 11 : i64} {
  func.func @_gin_layer_kernel(%arg0: i32, %arg1: i32, %arg2: memref<1xi32, #tpu.memory_space<smem>>, %arg3: memref<1xi32, #tpu.memory_space<smem>>, %arg4: memref<128x128xi8, #tpu.memory_space<vmem>>, %arg5: memref<128x128xbf16, #tpu.memory_space<vmem>>, %arg6: memref<128x128xbf16, #tpu.memory_space<vmem>>, %arg7: memref<1x128xf32, #tpu.memory_space<vmem>>, %arg8: memref<128x128xbf16, #tpu.memory_space<vmem>>, %arg9: memref<1x128xf32, #tpu.memory_space<vmem>>, %arg10: memref<128x128xbf16, #tpu.memory_space<vmem>>, %arg11: memref<128x128xf32, #tpu.memory_space<vmem>>) attributes {dimension_semantics = [#tpu.dimension_semantics<parallel>, #tpu.dimension_semantics<arbitrary>], iteration_bounds = array<i64: 1, 1>, scalar_prefetch = 2 : i64, scratch_operands = 1 : i64, tpu.core_type = #tpu.core_type<tc>, window_params = [{transform_indices = @transform_0, window_bounds = array<i64: 128, 128>}, {pipeline_mode = #tpu.pipeline_mode<synchronous>, transform_indices = @transform_1, window_bounds = array<i64: 128, 128>}, {pipeline_mode = #tpu.pipeline_mode<synchronous>, transform_indices = @transform_2, window_bounds = array<i64: 128, 128>}, {pipeline_mode = #tpu.pipeline_mode<synchronous>, transform_indices = @transform_3, window_bounds = array<i64: 1, 128>}, {pipeline_mode = #tpu.pipeline_mode<synchronous>, transform_indices = @transform_4, window_bounds = array<i64: 128, 128>}, {pipeline_mode = #tpu.pipeline_mode<synchronous>, transform_indices = @transform_5, window_bounds = array<i64: 1, 128>}, {transform_indices = @transform_6, window_bounds = array<i64: 128, 128>}]} {
    %c0_i32 = arith.constant 0 : i32
    %0 = arith.cmpi eq, %arg1, %c0_i32 : i32
    %1 = arith.extui %0 : i1 to i32
    %c0_i32_0 = arith.constant 0 : i32
    %2 = arith.cmpi ne, %1, %c0_i32_0 : i32
    scf.if %2 {
      %cst = arith.constant 0.000000e+00 : f32
      %16 = vector.broadcast %cst : f32 to vector<128x128xf32>
      %c0 = arith.constant 0 : index
      %c0_4 = arith.constant 0 : index
      %17 = vector.load %arg11[%c0, %c0_4] : memref<128x128xf32, #tpu.memory_space<vmem>>, vector<128x128xf32>
      tpu.vector_store %arg11[%c0, %c0_4], %16 {strides = array<i32>} : memref<128x128xf32, #tpu.memory_space<vmem>>, vector<128x128xf32>,
    } else {
    }
    %3 = arith.index_cast %arg0 : i32 to index
    %4 = memref.load %arg2[%3] : memref<1xi32, #tpu.memory_space<smem>>
    %5 = arith.index_cast %arg0 : i32 to index
    %6 = memref.load %arg3[%5] : memref<1xi32, #tpu.memory_space<smem>>
    %7 = arith.addi %4, %arg1 : i32
    %8 = arith.minsi %7, %6 : i32
    %9 = arith.addi %4, %arg1 : i32
    %10 = arith.cmpi sle, %9, %6 : i32
    %11 = arith.extui %10 : i1 to i32
    %c0_i32_1 = arith.constant 0 : i32
    %12 = arith.cmpi ne, %11, %c0_i32_1 : i32
    scf.if %12 {
      %c0 = arith.constant 0 : index
      %c0_4 = arith.constant 0 : index
      %16 = vector.load %arg4[%c0, %c0_4] : memref<128x128xi8, #tpu.memory_space<vmem>>, vector<128x128xi8>
      %17 = arith.sitofp %16 : vector<128x128xi8> to vector<128x128xbf16>
      %c128_i32 = arith.constant 128 : i32
      %18 = arith.muli %8, %c128_i32 : i32
      %19 = tpu.assume_multiple %18, 128 : i32
      %20 = arith.index_cast %19 : i32 to index
      %c0_5 = arith.constant 0 : index
      %21 = vector.load %arg5[%20, %c0_5] : memref<128x128xbf16, #tpu.memory_space<vmem>>, vector<128x128xbf16>
      %c0_6 = arith.constant 0 : index
      %c0_7 = arith.constant 0 : index
      %22 = vector.load %arg11[%c0_6, %c0_7] : memref<128x128xf32, #tpu.memory_space<vmem>>, vector<128x128xf32>
      %cst = arith.constant dense<0.000000e+00> : vector<128x128xf32>
      %23 = tpu.matmul %17, %21, %cst {dimension_numbers = #tpu.dot_dimension_numbers<[1], [0], [0], [1], [0, 0, 1, 1], [], []>} : vector<128x128xbf16>, vector<128x128xbf16>, vector<128x128xf32> -> vector<128x128xf32>
      %24 = arith.addf %22, %23 : vector<128x128xf32>
      %c0_8 = arith.constant 0 : index
      %c0_9 = arith.constant 0 : index
      %25 = vector.load %arg11[%c0_8, %c0_9] : memref<128x128xf32, #tpu.memory_space<vmem>>, vector<128x128xf32>
      tpu.vector_store %arg11[%c0_8, %c0_9], %24 {strides = array<i32>} : memref<128x128xf32, #tpu.memory_space<vmem>>, vector<128x128xf32>,
    } else {
    }
    %c0_i32_2 = arith.constant 0 : i32
    %13 = arith.cmpi eq, %arg1, %c0_i32_2 : i32
    %14 = arith.extui %13 : i1 to i32
    %c0_i32_3 = arith.constant 0 : i32
    %15 = arith.cmpi ne, %14, %c0_i32_3 : i32
    scf.if %15 {
      %c0 = arith.constant 0 : index
      %c0_4 = arith.constant 0 : index
      %16 = vector.load %arg11[%c0, %c0_4] : memref<128x128xf32, #tpu.memory_space<vmem>>, vector<128x128xf32>
      %17 = arith.truncf %16 : vector<128x128xf32> to vector<128x128xbf16>
      %c0_5 = arith.constant 0 : index
      %c0_6 = arith.constant 0 : index
      %18 = vector.load %arg6[%c0_5, %c0_6] : memref<128x128xbf16, #tpu.memory_space<vmem>>, vector<128x128xbf16>
      %cst = arith.constant dense<0.000000e+00> : vector<128x128xf32>
      %19 = tpu.matmul %17, %18, %cst {dimension_numbers = #tpu.dot_dimension_numbers<[1], [0], [0], [1], [0, 0, 1, 1], [], []>} : vector<128x128xbf16>, vector<128x128xbf16>, vector<128x128xf32> -> vector<128x128xf32>
      %c0_7 = arith.constant 0 : index
      %c0_8 = arith.constant 0 : index
      %20 = vector.load %arg7[%c0_7, %c0_8] : memref<1x128xf32, #tpu.memory_space<vmem>>, vector<1x128xf32>
      %21 = vector.broadcast %20 : vector<1x128xf32> to vector<128x128xf32>
      %22 = arith.addf %19, %21 : vector<128x128xf32>
      %cst_9 = arith.constant 0.000000e+00 : f32
      %23 = vector.broadcast %cst_9 : f32 to vector<128x128xf32>
      %24 = arith.maximumf %22, %23 : vector<128x128xf32>
      %25 = arith.truncf %24 : vector<128x128xf32> to vector<128x128xbf16>
      %c0_10 = arith.constant 0 : index
      %c0_11 = arith.constant 0 : index
      %26 = vector.load %arg8[%c0_10, %c0_11] : memref<128x128xbf16, #tpu.memory_space<vmem>>, vector<128x128xbf16>
      %cst_12 = arith.constant dense<0.000000e+00> : vector<128x128xf32>
      %27 = tpu.matmul %25, %26, %cst_12 {dimension_numbers = #tpu.dot_dimension_numbers<[1], [0], [0], [1], [0, 0, 1, 1], [], []>} : vector<128x128xbf16>, vector<128x128xbf16>, vector<128x128xf32> -> vector<128x128xf32>
      %c0_13 = arith.constant 0 : index
      %c0_14 = arith.constant 0 : index
      %28 = vector.load %arg9[%c0_13, %c0_14] : memref<1x128xf32, #tpu.memory_space<vmem>>, vector<1x128xf32>
      %29 = vector.broadcast %28 : vector<1x128xf32> to vector<128x128xf32>
      %30 = arith.addf %27, %29 : vector<128x128xf32>
      %cst_15 = arith.constant 0.000000e+00 : f32
      %31 = vector.broadcast %cst_15 : f32 to vector<128x128xf32>
      %32 = arith.maximumf %30, %31 : vector<128x128xf32>
      %33 = arith.truncf %32 : vector<128x128xf32> to vector<128x128xbf16>
      %c0_16 = arith.constant 0 : index
      %c0_17 = arith.constant 0 : index
      %34 = vector.load %arg10[%c0_16, %c0_17] : memref<128x128xbf16, #tpu.memory_space<vmem>>, vector<128x128xbf16>
      tpu.vector_store %arg10[%c0_16, %c0_17], %33 {strides = array<i32>} : memref<128x128xbf16, #tpu.memory_space<vmem>>, vector<128x128xbf16>,
    } else {
    }
    return
  }
  func.func @transform_0(%arg0: i32, %arg1: i32, %arg2: memref<1xi32, #tpu.memory_space<smem>>, %arg3: memref<1xi32, #tpu.memory_space<smem>>) -> (i32, i32) {
    %0 = arith.index_cast %arg0 : i32 to index
    %1 = memref.load %arg2[%0] : memref<1xi32, #tpu.memory_space<smem>>
    %2 = arith.addi %1, %arg1 : i32
    %3 = arith.index_cast %arg0 : i32 to index
    %4 = memref.load %arg3[%3] : memref<1xi32, #tpu.memory_space<smem>>
    %5 = arith.minsi %2, %4 : i32
    %c0_i32 = arith.constant 0 : i32
    return %arg0, %5 : i32, i32
  }
  func.func @transform_1(%arg0: i32, %arg1: i32, %arg2: memref<1xi32, #tpu.memory_space<smem>>, %arg3: memref<1xi32, #tpu.memory_space<smem>>) -> (i32, i32) {
    %c0_i32 = arith.constant 0 : i32
    %c0_i32_0 = arith.constant 0 : i32
    %c0_i32_1 = arith.constant 0 : i32
    return %c0_i32, %c0_i32_0 : i32, i32
  }
  func.func @transform_2(%arg0: i32, %arg1: i32, %arg2: memref<1xi32, #tpu.memory_space<smem>>, %arg3: memref<1xi32, #tpu.memory_space<smem>>) -> (i32, i32) {
    %c0_i32 = arith.constant 0 : i32
    %c0_i32_0 = arith.constant 0 : i32
    %c0_i32_1 = arith.constant 0 : i32
    return %c0_i32, %c0_i32_0 : i32, i32
  }
  func.func @transform_3(%arg0: i32, %arg1: i32, %arg2: memref<1xi32, #tpu.memory_space<smem>>, %arg3: memref<1xi32, #tpu.memory_space<smem>>) -> (i32, i32) {
    %c0_i32 = arith.constant 0 : i32
    %c0_i32_0 = arith.constant 0 : i32
    %c0_i32_1 = arith.constant 0 : i32
    return %c0_i32, %c0_i32_0 : i32, i32
  }
  func.func @transform_4(%arg0: i32, %arg1: i32, %arg2: memref<1xi32, #tpu.memory_space<smem>>, %arg3: memref<1xi32, #tpu.memory_space<smem>>) -> (i32, i32) {
    %c0_i32 = arith.constant 0 : i32
    %c0_i32_0 = arith.constant 0 : i32
    %c0_i32_1 = arith.constant 0 : i32
    return %c0_i32, %c0_i32_0 : i32, i32
  }
  func.func @transform_5(%arg0: i32, %arg1: i32, %arg2: memref<1xi32, #tpu.memory_space<smem>>, %arg3: memref<1xi32, #tpu.memory_space<smem>>) -> (i32, i32) {
    %c0_i32 = arith.constant 0 : i32
    %c0_i32_0 = arith.constant 0 : i32
    %c0_i32_1 = arith.constant 0 : i32
    return %c0_i32, %c0_i32_0 : i32, i32
  }
  func.func @transform_6(%arg0: i32, %arg1: i32, %arg2: memref<1xi32, #tpu.memory_space<smem>>, %arg3: memref<1xi32, #tpu.memory_space<smem>>) -> (i32, i32) {
    %c0_i32 = arith.constant 0 : i32
    %c0_i32_0 = arith.constant 0 : i32
    return %arg0, %c0_i32 : i32, i32
  }
}

</mosaic_0001>

<bundles_post_ra>
// kernel: tpu_custom_call.1
= control target key start
LH: loop header
LB: loop body
LE: loop exit
PB: predicated region body
PF: predicated region fallthrough
CT: control target
= control target key end

     0   :  { %15 = vsyncpa [#allocation7], 0  ;;  %s1452_s0 = inlined_call_operand.<no memory space> [shape: s32[1], index: 0, kind: input, shape index: {}]   ;;  %s1453_s1 = inlined_call_operand.<no memory space> [shape: s32[1], index: 1, kind: input, shape index: {}]   ;;  %s1454_s2 = inlined_call_operand.hbm [shape: s8[128,128], index: 2, kind: input, shape index: {}]   ;;  %s1455_s3 = inlined_call_operand.hbm [shape: bf16[128,128], index: 3, kind: input, shape index: {}]   ;;  %s1456_s4 = inlined_call_operand.hbm [shape: bf16[128,128], index: 4, kind: input, shape index: {}]   ;;  %s1457_s5 = inlined_call_operand.vmem [shape: f32[1,128], index: 5, kind: input, shape index: {}]   ;;  %s1458_s6 = inlined_call_operand.hbm [shape: bf16[128,128], index: 6, kind: input, shape index: {}]   ;;  %s1459_s7 = inlined_call_operand.vmem [shape: f32[1,128], index: 7, kind: input, shape index: {}]   ;;  %s1460_s8 = inlined_call_operand.hbm [shape: bf16[128,128], index: 8, kind: output, shape index: {}]  }
   0x1   :  { %16 = vsyncpa [#allocation10], 0 }
   0x2   :  { %17 = vsyncpa [#allocation13], 0 }
   0x3   :  { %18 = vsyncpa [#allocation8], 0  ;;  %s1280_s27 = smov [#allocation9]   ;;  %p24_p0 = scmp.lt.s32.totalorder %s1452_s0, %s1453_s1 }
   0x4   :  { %s43_s28 = sshll.u32 %s1280_s27, 4  ;;  %s1160_s13 = scalar_lea.hbm %s1455_s3, 1024  ;;  %s44_s28 = int_to_ptr.vmem [resolvable:$true] %s43_s28 }
   0x5   :  { %p1161_p1 = scmp.ne.s32.totalorder %s1455_s3, %s1160_s13  ;;  %p1164_p2 = scmp.lt.u32.totalorder %s1160_s13, %s1455_s3 }
   0x7   :  { %p1166_p3 = pnand %p1164_p2, %p1161_p1 }
   0x9   :  { %1169 = shalt.err (!%p1166_p3)
}
   0xa   :  { %s1170_s18 = scalar_lea.vmem %s44_s28, 1024  ;;  %p1175_p5 = scmp.lt.s32.totalorder %s44_s28, %s44_s28 }
   0xb   :  { %p1171_p4 = scmp.ne.s32.totalorder %s44_s28, %s1170_s18  ;;  %p1176_p6 = scmp.lt.s32.totalorder %s1170_s18, %s1170_s18 }
   0xd   :  { %p1177_p7 = por %p1176_p6, %p1175_p5 }
   0xf   :  { %p1178_p8 = pnand %p1177_p7, %p1171_p4 }
  0x11   :  { %1181 = shalt.err (!%p1178_p8)
}
  0x12   :  { %s1281_s19 = smov 64   ;;  %s1282_s20 = smov 4  }
  0x13   :  { %49 = dma.hbm_to_vmem [thread:$0]  %s1455_s3, 1024, %s44_s28, [#allocation10], %s1281_s19, %s1281_s19, %s1282_s20  }
  0x14   :  { %s1369_s10 = scalar_select %p24_p0, %s1452_s0, %s1453_s1 }
  0x15   :  { %s1283_s12 = smov [#allocation6]   ;;  %s1184_s18 = scalar_lea.hbm %s1454_s2, 512 }
  0x16   :  { %s857_s11 = sshll.u32 %s1369_s10, 7  ;;  %s31_s3 = sshll.u32 %s1283_s12, 4  ;;  %s32_s3 = int_to_ptr.vmem [resolvable:$true] %s31_s3 }
  0x17   :  { %s30_s14 = scalar_lea.hbm %s1454_s2, %s857_s11 }
  0x18   :  { %s1182_s15 = scalar_lea.hbm %s30_s14, 512  ;;  %p1185_p10 = scmp.lt.u32.totalorder %s30_s14, %s1454_s2 }
  0x19   :  { %p1183_p9 = scmp.ne.s32.totalorder %s30_s14, %s1182_s15  ;;  %p1186_p11 = scmp.lt.u32.totalorder %s1184_s18, %s1182_s15 }
  0x1a   :  { %p1188_p13 = scmp.lt.u32.totalorder %s1182_s15, %s30_s14 }
  0x1b   :  { %p1187_p12 = por %p1186_p11, %p1185_p10 }
  0x1d   :  { %p1189_p0 = por %p1188_p13, %p1187_p12 }
  0x1f   :  { %p1190_p1 = pnand %p1189_p0, %p1183_p9 }
  0x21   :  { %1193 = shalt.err (!%p1190_p1)
}
  0x22   :  { %s1194_s23 = scalar_lea.vmem %s32_s3, 512  ;;  %p1199_p3 = scmp.lt.s32.totalorder %s32_s3, %s32_s3 }
  0x23   :  { %p1195_p2 = scmp.ne.s32.totalorder %s32_s3, %s1194_s23  ;;  %p1200_p4 = scmp.lt.s32.totalorder %s1194_s23, %s1194_s23 }
  0x25   :  { %p1201_p5 = por %p1200_p4, %p1199_p3 }
  0x27   :  { %p1202_p6 = pnand %p1201_p5, %p1195_p2 }
  0x29   :  { %1205 = shalt.err (!%p1202_p6)
}
  0x2a   :  { %s1284_s24 = smov 128   ;;  %s1285_s25 = smov 8  }
  0x2b   :  { %37 = dma.hbm_to_vmem [thread:$0]  %s30_s14, 512, %s32_s3, [#allocation7], %s1284_s24, %s1284_s24, %s1285_s25  }
  0x2c   :  { %s1286_s26 = smov [#allocation11]   ;;  %s1287_s2 = smov [#allocation12]  }
  0x2d   :  { %s55_s27 = sshll.u32 %s1286_s26, 4  ;;  %s69_s29 = sshll.u32 %s1287_s2, 4  ;;  %s56_s27 = int_to_ptr.vmem [resolvable:$true] %s55_s27  ;;  %s70_s29 = int_to_ptr.vmem [resolvable:$true] %s69_s29 }
  0x2e   :  { %s1206_s12 = scalar_lea.hbm %s1456_s4, 1024 }
  0x2f   :  { %p1207_p7 = scmp.ne.s32.totalorder %s1456_s4, %s1206_s12  ;;  %p1210_p8 = scmp.lt.u32.totalorder %s1206_s12, %s1456_s4 }
  0x31   :  { %p1212_p9 = pnand %p1210_p8, %p1207_p7 }
  0x33   :  { %1215 = shalt.err (!%p1212_p9)
}
  0x34   :  { %s1216_s3 = scalar_lea.vmem %s56_s27, 1024  ;;  %p1221_p11 = scmp.lt.s32.totalorder %s56_s27, %s56_s27 }
  0x35   :  { %p1217_p10 = scmp.ne.s32.totalorder %s56_s27, %s1216_s3  ;;  %p1222_p12 = scmp.lt.s32.totalorder %s1216_s3, %s1216_s3 }
  0x37   :  { %p1223_p13 = por %p1222_p12, %p1221_p11 }
  0x39   :  { %p1224_p0 = pnand %p1223_p13, %p1217_p10 }
  0x3b   :  { %1227 = shalt.err (!%p1224_p0)
}
  0x3c   :  { %61 = dma.hbm_to_vmem [thread:$0]  %s1456_s4, 1024, %s56_s27, [#allocation10], %s1281_s19, %s1281_s19, %s1282_s20  }
  0x3d   :  { %s1228_s22 = scalar_lea.hbm %s1458_s6, 1024 }
  0x3e   :  { %p1229_p1 = scmp.ne.s32.totalorder %s1458_s6, %s1228_s22  ;;  %p1232_p2 = scmp.lt.u32.totalorder %s1228_s22, %s1458_s6 }
  0x40   :  { %p1234_p3 = pnand %p1232_p2, %p1229_p1 }
  0x42   :  { %1237 = shalt.err (!%p1234_p3)
}
  0x43   :  { %s1238_s2 = scalar_lea.vmem %s70_s29, 1024  ;;  %p1243_p5 = scmp.lt.s32.totalorder %s70_s29, %s70_s29 }
  0x44   :  { %p1239_p4 = scmp.ne.s32.totalorder %s70_s29, %s1238_s2  ;;  %p1244_p6 = scmp.lt.s32.totalorder %s1238_s2, %s1238_s2 }
  0x46   :  { %p1245_p7 = por %p1244_p6, %p1243_p5 }
  0x48   :  { %p1246_p8 = pnand %p1245_p7, %p1239_p4 }
  0x4a   :  { %1249 = shalt.err (!%p1246_p8)
}
  0x4b   :  { %75 = dma.hbm_to_vmem [thread:$0]  %s1458_s6, 1024, %s70_s29, [#allocation13], %s1281_s19, %s1281_s19, %s1282_s20  }
  0x4c   :  { %1272 = dma.done.wait [#allocation7], 512  }
  0x4d   :  { %1273 = vsyncadd [#allocation7], 4294966784 }
  0x4e   :  { %1274 = dma.done.wait [#allocation10], 2048  }
  0x4f   :  { %1275 = vsyncadd [#allocation10], 4294965248 }
  0x50   :  { %1276 = dma.done.wait [#allocation13], 1024  }
  0x51   :  { %1277 = vsyncadd [#allocation13], 4294966272  ;;  %v1288_v0 = vmov 0.0   ;;  %p858_p9 = scmp.gt.s32.totalorder %s1452_s0, %s1453_s1 }
  0x52   :  { %100 = vst [vmem:[#allocation2] sm:$0xff] %v1288_v0  ;;  %101 = vst [vmem:[#allocation2 + $0x8] sm:$0xff] %v1288_v0  ;;  %s138_s12 = sshra.s32 (!%p858_p9), %s857_s11, 3  ;;  %v125_v1 = vld [vmem:[#allocation6] sm:$0xff] (!%p858_p9)  ;;  %v127_v2 = vld [vmem:[#allocation6 + $0x10] sm:$0xff] (!%p858_p9) }
  0x53   :  { %102 = vst [vmem:[#allocation2 + $0x10] sm:$0xff] %v1288_v0  ;;  %103 = vst [vmem:[#allocation2 + $0x18] sm:$0xff] %v1288_v0  ;;  %124 = sbr.rel (%p858_p9) target bundleno = 344 (0x158), region = 49  ;;  %s860_s28 = sshll.u32 (!%p858_p9), %s138_s12, 2  ;;  %v129_v3 = vunpack.c.l.s8.bf16 (!%p858_p9), %v125_v1  ;;  %v133_v4 = vunpack.c.l.s8.bf16 (!%p858_p9), %v127_v2  ;;  %v126_v13 = vld [vmem:[#allocation6 + $0x8] sm:$0xff] (!%p858_p9)  ;;  %v128_v14 = vld [vmem:[#allocation6 + $0x18] sm:$0xff] (!%p858_p9)  ;;  %v130_v15 = vunpack.c.h.s8.bf16 (!%p858_p9), %v125_v1  ;;  %v134_v16 = vunpack.c.h.s8.bf16 (!%p858_p9), %v127_v2 }
  0x54   :  { %104 = vst [vmem:[#allocation2 + $0x20] sm:$0xff] %v1288_v0  ;;  %105 = vst [vmem:[#allocation2 + $0x28] sm:$0xff] %v1288_v0  ;;  %s1421_s13 = scalar_lea.vmem (!%p858_p9), [#allocation9], %s860_s28  ;;  %v131_v17 = vunpack.c.l.s8.bf16 (!%p858_p9), %v126_v13  ;;  %v135_v18 = vunpack.c.l.s8.bf16 (!%p858_p9), %v128_v14  ;;  %v132_v19 = vunpack.c.h.s8.bf16 (!%p858_p9), %v126_v13  ;;  %v136_v20 = vunpack.c.h.s8.bf16 (!%p858_p9), %v128_v14 }
  0x55   :  { %106 = vst [vmem:[#allocation2 + $0x30] sm:$0xff] %v1288_v0  ;;  %107 = vst [vmem:[#allocation2 + $0x38] sm:$0xff] %v1288_v0  ;;  %v1136_v5 = vld [vmem:[%s1421_s13] sm:$0xff] (!%p858_p9)   ;;  %1030 = vmatprep.mubr.bf16.mxu0 (!%p858_p9), %v129_v3  ;;  %1038 = vmatprep.mubr.bf16.mxu1 (!%p858_p9), %v133_v4  ;;  %v1137_v6 = vld [vmem:[%s1421_s13 + $0x8] sm:$0xff] (!%p858_p9)  }
  0x56   :  { %108 = vst [vmem:[#allocation2 + $0x40] sm:$0xff] %v1288_v0  ;;  %109 = vst [vmem:[#allocation2 + $0x48] sm:$0xff] %v1288_v0  ;;  %1014 = vmatprep.subr.bf16.mxu0 (!%p858_p9), %v1136_v5  ;;  %1110 = vmatprep.subr.bf16.mxu1 (!%p858_p9), %v1136_v5  ;;  %v1138_v7 = vld [vmem:[%s1421_s13 + $0x10] sm:$0xff] (!%p858_p9)   ;;  %v1139_v8 = vld [vmem:[%s1421_s13 + $0x18] sm:$0xff] (!%p858_p9)  }
  0x57   :  { %110 = vst [vmem:[#allocation2 + $0x50] sm:$0xff] %v1288_v0  ;;  %111 = vst [vmem:[#allocation2 + $0x58] sm:$0xff] %v1288_v0  ;;  %1015 = vmatpush3.bf16.msra.mxu0 (!%p858_p9), %v1136_v5  ;;  %1118 = vmatpush3.bf16.msra.mxu1 (!%p858_p9), %v1136_v5  ;;  %v1140_v9 = vld [vmem:[%s1421_s13 + $0x20] sm:$0xff] (!%p858_p9)   ;;  %v1141_v10 = vld [vmem:[%s1421_s13 + $0x28] sm:$0xff] (!%p858_p9)  }
  0x58   :  { %112 = vst [vmem:[#allocation2 + $0x60] sm:$0xff] %v1288_v0  ;;  %113 = vst [vmem:[#allocation2 + $0x68] sm:$0xff] %v1288_v0  ;;  %1016 = vmatprep.subr.bf16.mxu0 (!%p858_p9), %v1137_v6  ;;  %1111 = vmatprep.subr.bf16.mxu1 (!%p858_p9), %v1137_v6  ;;  %v1142_v11 = vld [vmem:[%s1421_s13 + $0x30] sm:$0xff] (!%p858_p9)   ;;  %v1143_v12 = vld [vmem:[%s1421_s13 + $0x38] sm:$0xff] (!%p858_p9)  }
  0x59   :  { %114 = vst [vmem:[#allocation2 + $0x70] sm:$0xff] %v1288_v0  ;;  %115 = vst [vmem:[#allocation2 + $0x78] sm:$0xff] %v1288_v0  ;;  %v158_v23 = vld [vmem:[#allocation2] sm:$0xff] (!%p858_p9)  ;;  %v159_v33 = vld [vmem:[#allocation2 + $0x8] sm:$0xff] (!%p858_p9) }
  0x5a   :  { %v160_v21 = vld [vmem:[#allocation2 + $0x10] sm:$0xff]  ;;  %v161_v27 = vld [vmem:[#allocation2 + $0x18] sm:$0xff] }
  0x5b   :  { %1017 = vmatpush3.bf16.msra.mxu0 %v1137_v6  ;;  %1119 = vmatpush3.bf16.msra.mxu1 %v1137_v6  ;;  %v162_v47 = vld [vmem:[#allocation2 + $0x20] sm:$0xff]  ;;  %v163_v57 = vld [vmem:[#allocation2 + $0x28] sm:$0xff] }
  0x5c   :  { %1018 = vmatprep.subr.bf16.mxu0 %v1138_v7  ;;  %1112 = vmatprep.subr.bf16.mxu1 %v1138_v7  ;;  %v164_v45 = vld [vmem:[#allocation2 + $0x30] sm:$0xff]  ;;  %v165_v51 = vld [vmem:[#allocation2 + $0x38] sm:$0xff] }
  0x5d   :  { %v166_v24 = vld [vmem:[#allocation2 + $0x40] sm:$0xff]  ;;  %v167_v34 = vld [vmem:[#allocation2 + $0x48] sm:$0xff] }
  0x5e   :  { %v168_v22 = vld [vmem:[#allocation2 + $0x50] sm:$0xff]  ;;  %v169_v28 = vld [vmem:[#allocation2 + $0x58] sm:$0xff] }
  0x5f   :  { %1019 = vmatpush3.bf16.msra.mxu0 %v1138_v7  ;;  %1120 = vmatpush3.bf16.msra.mxu1 %v1138_v7  ;;  %v170_v48 = vld [vmem:[#allocation2 + $0x60] sm:$0xff]  ;;  %v171_v58 = vld [vmem:[#allocation2 + $0x68] sm:$0xff] }
  0x60   :  { %1020 = vmatprep.subr.bf16.mxu0 %v1139_v8  ;;  %1113 = vmatprep.subr.bf16.mxu1 %v1139_v8  ;;  %v172_v46 = vld [vmem:[#allocation2 + $0x70] sm:$0xff]  ;;  %v173_v52 = vld [vmem:[#allocation2 + $0x78] sm:$0xff] }
  0x63   :  { %1021 = vmatpush3.bf16.msra.mxu0 %v1139_v8  ;;  %1121 = vmatpush3.bf16.msra.mxu1 %v1139_v8 }
  0x64   :  { %1022 = vmatprep.subr.bf16.mxu0 %v1140_v9  ;;  %1114 = vmatprep.subr.bf16.mxu1 %v1140_v9 }
  0x67   :  { %1023 = vmatpush3.bf16.msra.mxu0 %v1140_v9  ;;  %1122 = vmatpush3.bf16.msra.mxu1 %v1140_v9 }
  0x68   :  { %1024 = vmatprep.subr.bf16.mxu0 %v1141_v10  ;;  %1115 = vmatprep.subr.bf16.mxu1 %v1141_v10 }
  0x6b   :  { %1025 = vmatpush3.bf16.msra.mxu0 %v1141_v10  ;;  %1123 = vmatpush3.bf16.msra.mxu1 %v1141_v10 }
  0x6c   :  { %1026 = vmatprep.subr.bf16.mxu0 %v1142_v11  ;;  %1116 = vmatprep.subr.bf16.mxu1 %v1142_v11 }
  0x6f   :  { %1027 = vmatpush3.bf16.msra.mxu0 %v1142_v11  ;;  %1124 = vmatpush3.bf16.msra.mxu1 %v1142_v11 }
  0x70   :  { %1028 = vmatprep.subr.bf16.mxu0 %v1143_v12  ;;  %1117 = vmatprep.subr.bf16.mxu1 %v1143_v12 }
  0x73   :  { %1029 = vmatpush3.bf16.msra.mxu0 %v1143_v12  ;;  %1125 = vmatpush3.bf16.msra.mxu1 %v1143_v12 }
  0x76   :  { %1031 = vmatmul.mubr.bf16.vlgmr.msra.gmra.mrb[0].mxu0 %v130_v15  ;;  %1039 = vmatmul.mubr.bf16.vlgmr.msra.gmra.mrb[0].mxu1 %v134_v16 }
  0x77   :  { %1034 = vmatprep.mubr.bf16.mxu0 %v131_v17  ;;  %1042 = vmatprep.mubr.bf16.mxu1 %v135_v18 }
  0x7e   :  { %1035 = vmatmul.mubr.bf16.gmra.mrb[4].mxu0 %v132_v19  ;;  %1043 = vmatmul.mubr.bf16.gmra.mrb[4].mxu1 %v136_v20 }
 0x149   :  { %v1032_v25 = vpop.f32.mrb[0].mxu0  ;;  %v1040_v26 = vpop.f32.mrb[0].mxu1 }
 0x14a   :  { %v321_v29 = vadd.f32 %v1032_v25, %v160_v21  ;;  %v329_v30 = vadd.f32 %v1040_v26, %v168_v22  ;;  %v256_v31 = vpop.f32.mrb[1].mxu0  ;;  %v288_v32 = vpop.f32.mrb[1].mxu1 }
 0x14b   :  { %v319_v35 = vadd.f32 %v256_v31, %v158_v23  ;;  %v327_v36 = vadd.f32 %v288_v32, %v166_v24  ;;  %v1033_v37 = vpop.f32.mrb[2].mxu0  ;;  %v1041_v38 = vpop.f32.mrb[2].mxu1 }
 0x14c   :  { %337 = vst [vmem:[#allocation2 + $0x10] sm:$0xff] %v321_v29  ;;  %345 = vst [vmem:[#allocation2 + $0x50] sm:$0xff] %v329_v30  ;;  %v322_v39 = vadd.f32 %v1033_v37, %v161_v27  ;;  %v330_v40 = vadd.f32 %v1041_v38, %v169_v28  ;;  %v259_v41 = vpop.f32.mrb[3].mxu0  ;;  %v291_v42 = vpop.f32.mrb[3].mxu1 }
 0x14d   :  { %335 = vst [vmem:[#allocation2] sm:$0xff] %v319_v35  ;;  %343 = vst [vmem:[#allocation2 + $0x40] sm:$0xff] %v327_v36  ;;  %v320_v43 = vadd.f32 %v259_v41, %v159_v33  ;;  %v328_v44 = vadd.f32 %v291_v42, %v167_v34 }
 0x14e   :  { %338 = vst [vmem:[#allocation2 + $0x18] sm:$0xff] %v322_v39  ;;  %346 = vst [vmem:[#allocation2 + $0x58] sm:$0xff] %v330_v40 }
 0x14f   :  { %336 = vst [vmem:[#allocation2 + $0x8] sm:$0xff] %v320_v43  ;;  %344 = vst [vmem:[#allocation2 + $0x48] sm:$0xff] %v328_v44 }
 0x151   :  { %v1036_v49 = vpop.f32.mrb[4].mxu0  ;;  %v1044_v50 = vpop.f32.mrb[4].mxu1 }
 0x152   :  { %v325_v53 = vadd.f32 %v1036_v49, %v164_v45  ;;  %v333_v54 = vadd.f32 %v1044_v50, %v172_v46  ;;  %v272_v55 = vpop.f32.mrb[5].mxu0  ;;  %v304_v56 = vpop.f32.mrb[5].mxu1 }
 0x153   :  { %v323_v59 = vadd.f32 %v272_v55, %v162_v47  ;;  %v331_v60 = vadd.f32 %v304_v56, %v170_v48  ;;  %v1037_v61 = vpop.f32.mrb[6].mxu0  ;;  %v1045_v62 = vpop.f32.mrb[6].mxu1 }
 0x154   :  { %341 = vst [vmem:[#allocation2 + $0x30] sm:$0xff] %v325_v53  ;;  %349 = vst [vmem:[#allocation2 + $0x70] sm:$0xff] %v333_v54  ;;  %v326_v63 = vadd.f32 %v1037_v61, %v165_v51  ;;  %v334_v0 = vadd.f32 %v1045_v62, %v173_v52  ;;  %v275_v1 = vpop.f32.mrb[7].mxu0  ;;  %v307_v2 = vpop.f32.mrb[7].mxu1 }
 0x155   :  { %339 = vst [vmem:[#allocation2 + $0x20] sm:$0xff] %v323_v59  ;;  %347 = vst [vmem:[#allocation2 + $0x60] sm:$0xff] %v331_v60  ;;  %v324_v3 = vadd.f32 %v275_v1, %v163_v57  ;;  %v332_v4 = vadd.f32 %v307_v2, %v171_v58 }
 0x156   :  { %342 = vst [vmem:[#allocation2 + $0x38] sm:$0xff] %v326_v63  ;;  %350 = vst [vmem:[#allocation2 + $0x78] sm:$0xff] %v334_v0 }
 0x157   :  { %340 = vst [vmem:[#allocation2 + $0x28] sm:$0xff] %v324_v3  ;;  %348 = vst [vmem:[#allocation2 + $0x68] sm:$0xff] %v332_v4 }
 0x158 PF:  { %v1144_v5 = vld [vmem:[#allocation11] sm:$0xff]   ;;  %v1145_v6 = vld [vmem:[#allocation11 + $0x8] sm:$0xff]   ;;  %v1146_v7 = vld [vmem:[#allocation11 + $0x10] sm:$0xff]  }
 0x159   :  { %1046 = vmatprep.subr.bf16.mxu0 %v1144_v5  ;;  %v1147_v8 = vld [vmem:[#allocation11 + $0x18] sm:$0xff]   ;;  %v354_v9 = vld [vmem:[#allocation2] sm:$0xff]  ;;  %v355_v10 = vld [vmem:[#allocation2 + $0x8] sm:$0xff] }
 0x15a   :  { %1047 = vmatpush3.bf16.msra.mxu0 %v1144_v5  ;;  %v370_v11 = vpack.c.bf16 %v355_v10, %v354_v9  ;;  %v1148_v12 = vld [vmem:[#allocation11 + $0x20] sm:$0xff]   ;;  %v1153_v14 = vld [vmem:[#allocation12 + $0x8] sm:$0xff]   ;;  %v1154_v16 = vld [vmem:[#allocation12 + $0x10] sm:$0xff]  }
 0x15b   :  { %1048 = vmatprep.subr.bf16.mxu0 %v1145_v6  ;;  %v1152_v13 = vld [vmem:[#allocation12] sm:$0xff]   ;;  %v1149_v15 = vld [vmem:[#allocation11 + $0x28] sm:$0xff]   ;;  %v1150_v17 = vld [vmem:[#allocation11 + $0x30] sm:$0xff]  }
 0x15c   :  { %1062 = vmatprep.mubr.bf16.mxu0 %v370_v11  ;;  %1078 = vmatprep.subr.bf16.mxu1 %v1152_v13  ;;  %v1155_v18 = vld [vmem:[#allocation12 + $0x18] sm:$0xff]   ;;  %v1156_v20 = vld [vmem:[#allocation12 + $0x20] sm:$0xff]   ;;  %v356_v21 = vld [vmem:[#allocation2 + $0x10] sm:$0xff] }
 0x15d   :  { %1079 = vmatpush3.bf16.msra.mxu1 %v1152_v13  ;;  %v1151_v19 = vld [vmem:[#allocation11 + $0x38] sm:$0xff]   ;;  %v358_v23 = vld [vmem:[#allocation2 + $0x20] sm:$0xff]  ;;  %v1157_v26 = vld [vmem:[#allocation12 + $0x28] sm:$0xff]  }
 0x15e   :  { %1049 = vmatpush3.bf16.msra.mxu0 %v1145_v6  ;;  %1080 = vmatprep.subr.bf16.mxu1 %v1153_v14  ;;  %v357_v22 = vld [vmem:[#allocation2 + $0x18] sm:$0xff]  ;;  %v359_v24 = vld [vmem:[#allocation2 + $0x28] sm:$0xff]  ;;  %v360_v28 = vld [vmem:[#allocation2 + $0x30] sm:$0xff] }
 0x15f   :  { %1050 = vmatprep.subr.bf16.mxu0 %v1146_v7  ;;  %v371_v25 = vpack.c.bf16 %v357_v22, %v356_v21  ;;  %v372_v27 = vpack.c.bf16 %v359_v24, %v358_v23  ;;  %v361_v29 = vld [vmem:[#allocation2 + $0x38] sm:$0xff]  ;;  %v362_v30 = vld [vmem:[#allocation2 + $0x40] sm:$0xff]  ;;  %v363_v31 = vld [vmem:[#allocation2 + $0x48] sm:$0xff] }
 0x160   :  { %v373_v32 = vpack.c.bf16 %v361_v29, %v360_v28  ;;  %v374_v33 = vpack.c.bf16 %v363_v31, %v362_v30  ;;  %v364_v34 = vld [vmem:[#allocation2 + $0x50] sm:$0xff]  ;;  %v365_v35 = vld [vmem:[#allocation2 + $0x58] sm:$0xff]  ;;  %v366_v36 = vld [vmem:[#allocation2 + $0x60] sm:$0xff] }
 0x161   :  { %1081 = vmatpush3.bf16.msra.mxu1 %v1153_v14  ;;  %v367_v37 = vld [vmem:[#allocation2 + $0x68] sm:$0xff]  ;;  %v375_v38 = vpack.c.bf16 %v365_v35, %v364_v34  ;;  %v368_v40 = vld [vmem:[#allocation2 + $0x70] sm:$0xff]  ;;  %v369_v41 = vld [vmem:[#allocation2 + $0x78] sm:$0xff] }
 0x162   :  { %1051 = vmatpush3.bf16.msra.mxu0 %v1146_v7  ;;  %1082 = vmatprep.subr.bf16.mxu1 %v1154_v16  ;;  %v376_v39 = vpack.c.bf16 %v367_v37, %v366_v36  ;;  %v377_v42 = vpack.c.bf16 %v369_v41, %v368_v40  ;;  %v1158_v43 = vld [vmem:[#allocation12 + $0x30] sm:$0xff]   ;;  %v1159_v44 = vld [vmem:[#allocation12 + $0x38] sm:$0xff]   ;;  %v869_v45 = vld [vmem:[%s1457_s5] ss:$0 sm:$0xff] }
 0x163   :  { %1052 = vmatprep.subr.bf16.mxu0 %v1147_v8 }
 0x165   :  { %1083 = vmatpush3.bf16.msra.mxu1 %v1154_v16 }
 0x166   :  { %1053 = vmatpush3.bf16.msra.mxu0 %v1147_v8  ;;  %1084 = vmatprep.subr.bf16.mxu1 %v1155_v18 }
 0x167   :  { %1054 = vmatprep.subr.bf16.mxu0 %v1148_v12 }
 0x169   :  { %1085 = vmatpush3.bf16.msra.mxu1 %v1155_v18 }
 0x16a   :  { %1055 = vmatpush3.bf16.msra.mxu0 %v1148_v12  ;;  %1086 = vmatprep.subr.bf16.mxu1 %v1156_v20 }
 0x16b   :  { %1056 = vmatprep.subr.bf16.mxu0 %v1149_v15 }
 0x16d   :  { %1087 = vmatpush3.bf16.msra.mxu1 %v1156_v20 }
 0x16e   :  { %1057 = vmatpush3.bf16.msra.mxu0 %v1149_v15  ;;  %1088 = vmatprep.subr.bf16.mxu1 %v1157_v26 }
 0x16f   :  { %1058 = vmatprep.subr.bf16.mxu0 %v1150_v17 }
 0x171   :  { %1089 = vmatpush3.bf16.msra.mxu1 %v1157_v26 }
 0x172   :  { %1059 = vmatpush3.bf16.msra.mxu0 %v1150_v17  ;;  %1090 = vmatprep.subr.bf16.mxu1 %v1158_v43 }
 0x173   :  { %1060 = vmatprep.subr.bf16.mxu0 %v1151_v19 }
 0x175   :  { %1091 = vmatpush3.bf16.msra.mxu1 %v1158_v43 }
 0x176   :  { %1061 = vmatpush3.bf16.msra.mxu0 %v1151_v19  ;;  %1092 = vmatprep.subr.bf16.mxu1 %v1159_v44 }
 0x179   :  { %1063 = vmatmul.mubr.bf16.vlgmr.msra.gmra.mrb[0].mxu0 %v371_v25  ;;  %1093 = vmatpush3.bf16.msra.mxu1 %v1159_v44 }
 0x17a   :  { %1066 = vmatprep.mubr.bf16.mxu0 %v372_v27 }
 0x181   :  { %1067 = vmatmul.mubr.bf16.gmra.mrb[4].mxu0 %v373_v32 }
 0x182   :  { %1070 = vmatprep.mubr.bf16.mxu0 %v374_v33 }
 0x189   :  { %1071 = vmatmul.mubr.bf16.gmra.mrb[8].mxu0 %v375_v38  ;;  %v878_v38 = vld [vmem:[%s1459_s7] ss:$0 sm:$0xff]  ;;  %s1289_s7 = smov [#allocation14]  }
 0x18a   :  { %1074 = vmatprep.mubr.bf16.mxu0 %v376_v39  ;;  %s839_s11 = sshll.u32 %s1289_s7, 4  ;;  %s840_s11 = int_to_ptr.vmem [resolvable:$true] %s839_s11 }
 0x18b   :  { %s1250_s15 = scalar_lea.vmem %s840_s11, 1024  ;;  %p1255_p11 = scmp.lt.s32.totalorder %s840_s11, %s840_s11 }
 0x18c   :  { %p1251_p10 = scmp.ne.s32.totalorder %s840_s11, %s1250_s15  ;;  %p1256_p12 = scmp.lt.s32.totalorder %s1250_s15, %s1250_s15 }
 0x18e   :  { %p1257_p13 = por %p1256_p12, %p1255_p11 }
 0x190   :  { %p1258_p0 = pnand %p1257_p13, %p1251_p10 }
 0x191   :  { %1075 = vmatmul.mubr.bf16.gmra.mrb[12].mxu0 %v377_v42 }
 0x24c   :  { %v1064_v46 = vpop.f32.mrb[0].mxu0 }
 0x24d   :  { %v492_v47 = vadd.f32 %v1064_v46, %v869_v45  ;;  %v483_v48 = vpop.f32.mrb[1].mxu0 }
 0x24e   :  { %v484_v49 = vadd.f32 %v869_v45, %v483_v48  ;;  %v1065_v50 = vpop.f32.mrb[2].mxu0 }
 0x24f   :  { %v495_v51 = vadd.f32 %v1065_v50, %v869_v45  ;;  %v486_v52 = vpop.f32.mrb[3].mxu0  ;;  %v548_v54 = vmax.f32 %v492_v47, 0.0 }
 0x250   :  { %v487_v53 = vadd.f32 %v869_v45, %v486_v52  ;;  %v546_v56 = vmax.f32 %v484_v49, 0.0 }
 0x251   :  { %v549_v55 = vmax.f32 %v495_v51, 0.0 }
 0x252   :  { %v547_v57 = vmax.f32 %v487_v53, 0.0 }
 0x253   :  { %v563_v58 = vpack.c.bf16 %v549_v55, %v548_v54 }
 0x254   :  { %v1068_v59 = vpop.f32.mrb[4].mxu0  ;;  %v562_v60 = vpack.c.bf16 %v547_v57, %v546_v56 }
 0x255   :  { %v508_v61 = vadd.f32 %v1068_v59, %v869_v45  ;;  %v499_v62 = vpop.f32.mrb[5].mxu0 }
 0x256   :  { %v500_v63 = vadd.f32 %v869_v45, %v499_v62  ;;  %v1069_v0 = vpop.f32.mrb[6].mxu0  ;;  %1094 = vmatprep.mubr.bf16.mxu1 %v562_v60 }
 0x257   :  { %v511_v1 = vadd.f32 %v1069_v0, %v869_v45  ;;  %v502_v2 = vpop.f32.mrb[7].mxu0  ;;  %1095 = vmatmul.mubr.bf16.vlgmr.msra.gmra.mrb[0].mxu1 %v563_v58  ;;  %v552_v4 = vmax.f32 %v508_v61, 0.0 }
 0x258   :  { %v503_v3 = vadd.f32 %v869_v45, %v502_v2  ;;  %v550_v6 = vmax.f32 %v500_v63, 0.0 }
 0x259   :  { %v553_v5 = vmax.f32 %v511_v1, 0.0 }
 0x25a   :  { %v551_v7 = vmax.f32 %v503_v3, 0.0 }
 0x25b   :  { %v565_v8 = vpack.c.bf16 %v553_v5, %v552_v4 }
 0x25c   :  { %v564_v9 = vpack.c.bf16 %v551_v7, %v550_v6  ;;  %v1072_v10 = vpop.f32.mrb[8].mxu0 }
 0x25d   :  { %v524_v11 = vadd.f32 %v1072_v10, %v869_v45  ;;  %v515_v12 = vpop.f32.mrb[9].mxu0 }
 0x25e   :  { %v516_v13 = vadd.f32 %v869_v45, %v515_v12  ;;  %v1073_v14 = vpop.f32.mrb[10].mxu0  ;;  %1098 = vmatprep.mubr.bf16.mxu1 %v564_v9 }
 0x25f   :  { %v527_v15 = vadd.f32 %v1073_v14, %v869_v45  ;;  %v518_v16 = vpop.f32.mrb[11].mxu0  ;;  %1099 = vmatmul.mubr.bf16.gmra.mrb[4].mxu1 %v565_v8  ;;  %v556_v18 = vmax.f32 %v524_v11, 0.0 }
 0x260   :  { %v519_v17 = vadd.f32 %v869_v45, %v518_v16  ;;  %v554_v20 = vmax.f32 %v516_v13, 0.0 }
 0x261   :  { %v557_v19 = vmax.f32 %v527_v15, 0.0 }
 0x262   :  { %v555_v21 = vmax.f32 %v519_v17, 0.0 }
 0x263   :  { %v567_v22 = vpack.c.bf16 %v557_v19, %v556_v18 }
 0x264   :  { %v566_v23 = vpack.c.bf16 %v555_v21, %v554_v20  ;;  %v1076_v24 = vpop.f32.mrb[12].mxu0 }
 0x265   :  { %v540_v25 = vadd.f32 %v1076_v24, %v869_v45  ;;  %v531_v26 = vpop.f32.mrb[13].mxu0 }
 0x266   :  { %v532_v27 = vadd.f32 %v869_v45, %v531_v26  ;;  %v1077_v28 = vpop.f32.mrb[14].mxu0  ;;  %1102 = vmatprep.mubr.bf16.mxu1 %v566_v23 }
 0x267   :  { %v543_v29 = vadd.f32 %v1077_v28, %v869_v45  ;;  %v534_v30 = vpop.f32.mrb[15].mxu0  ;;  %1103 = vmatmul.mubr.bf16.gmra.mrb[8].mxu1 %v567_v22  ;;  %v560_v32 = vmax.f32 %v540_v25, 0.0 }
 0x268   :  { %v535_v31 = vadd.f32 %v869_v45, %v534_v30  ;;  %v558_v34 = vmax.f32 %v532_v27, 0.0 }
 0x269   :  { %v561_v33 = vmax.f32 %v543_v29, 0.0 }
 0x26a   :  { %v559_v35 = vmax.f32 %v535_v31, 0.0 }
 0x26b   :  { %v569_v36 = vpack.c.bf16 %v561_v33, %v560_v32 }
 0x26c   :  { %v568_v37 = vpack.c.bf16 %v559_v35, %v558_v34 }
 0x26e   :  { %1106 = vmatprep.mubr.bf16.mxu1 %v568_v37 }
 0x26f   :  { %1107 = vmatmul.mubr.bf16.gmra.mrb[12].mxu1 %v569_v36 }
 0x32a   :  { %v1096_v39 = vpop.f32.mrb[0].mxu1 }
 0x32b   :  { %v684_v40 = vadd.f32 %v1096_v39, %v878_v38  ;;  %v675_v41 = vpop.f32.mrb[1].mxu1 }
 0x32c   :  { %v676_v42 = vadd.f32 %v878_v38, %v675_v41  ;;  %v1097_v43 = vpop.f32.mrb[2].mxu1 }
 0x32d   :  { %v687_v44 = vadd.f32 %v1097_v43, %v878_v38  ;;  %v678_v46 = vpop.f32.mrb[3].mxu1  ;;  %v740_v47 = vmax.f32 %v684_v40, 0.0 }
 0x32e   :  { %v679_v45 = vadd.f32 %v878_v38, %v678_v46  ;;  %v738_v49 = vmax.f32 %v676_v42, 0.0 }
 0x32f   :  { %v741_v48 = vmax.f32 %v687_v44, 0.0 }
 0x330   :  { %v739_v50 = vmax.f32 %v679_v45, 0.0 }
 0x331   :  { %v927_v51 = vpack.c.bf16 %v741_v48, %v740_v47 }
 0x332   :  { %v922_v52 = vpack.c.bf16 %v739_v50, %v738_v49  ;;  %v1100_v53 = vpop.f32.mrb[4].mxu1 }
 0x333   :  { %959 = vst [vmem:[#allocation14 + $0x8] sm:$0xff] %v927_v51   ;;  %v700_v54 = vadd.f32 %v1100_v53, %v878_v38  ;;  %v691_v55 = vpop.f32.mrb[5].mxu1 }
 0x334   :  { %923 = vst [vmem:[#allocation14] sm:$0xff] %v922_v52   ;;  %v692_v56 = vadd.f32 %v878_v38, %v691_v55  ;;  %v1101_v57 = vpop.f32.mrb[6].mxu1 }
 0x335   :  { %v703_v58 = vadd.f32 %v1101_v57, %v878_v38  ;;  %v694_v59 = vpop.f32.mrb[7].mxu1  ;;  %v744_v61 = vmax.f32 %v700_v54, 0.0 }
 0x336   :  { %v695_v60 = vadd.f32 %v878_v38, %v694_v59  ;;  %v742_v63 = vmax.f32 %v692_v56, 0.0 }
 0x337   :  { %v745_v62 = vmax.f32 %v703_v58, 0.0 }
 0x338   :  { %v743_v0 = vmax.f32 %v695_v60, 0.0 }
 0x339   :  { %v937_v1 = vpack.c.bf16 %v745_v62, %v744_v61 }
 0x33a   :  { %v932_v2 = vpack.c.bf16 %v743_v0, %v742_v63  ;;  %v1104_v3 = vpop.f32.mrb[8].mxu1 }
 0x33b   :  { %961 = vst [vmem:[#allocation14 + $0x18] sm:$0xff] %v937_v1   ;;  %v716_v4 = vadd.f32 %v1104_v3, %v878_v38  ;;  %v707_v5 = vpop.f32.mrb[9].mxu1 }
 0x33c   :  { %960 = vst [vmem:[#allocation14 + $0x10] sm:$0xff] %v932_v2   ;;  %v708_v6 = vadd.f32 %v878_v38, %v707_v5  ;;  %v1105_v7 = vpop.f32.mrb[10].mxu1 }
 0x33d   :  { %v719_v8 = vadd.f32 %v1105_v7, %v878_v38  ;;  %v710_v9 = vpop.f32.mrb[11].mxu1  ;;  %v748_v11 = vmax.f32 %v716_v4, 0.0 }
 0x33e   :  { %v711_v10 = vadd.f32 %v878_v38, %v710_v9  ;;  %v746_v13 = vmax.f32 %v708_v6, 0.0 }
 0x33f   :  { %v749_v12 = vmax.f32 %v719_v8, 0.0 }
 0x340   :  { %v747_v14 = vmax.f32 %v711_v10, 0.0 }
 0x341   :  { %v947_v15 = vpack.c.bf16 %v749_v12, %v748_v11 }
 0x342   :  { %v942_v16 = vpack.c.bf16 %v747_v14, %v746_v13  ;;  %v1108_v17 = vpop.f32.mrb[12].mxu1 }
 0x343   :  { %963 = vst [vmem:[#allocation14 + $0x28] sm:$0xff] %v947_v15   ;;  %v732_v18 = vadd.f32 %v1108_v17, %v878_v38  ;;  %v723_v19 = vpop.f32.mrb[13].mxu1 }
 0x344   :  { %962 = vst [vmem:[#allocation14 + $0x20] sm:$0xff] %v942_v16   ;;  %v724_v20 = vadd.f32 %v878_v38, %v723_v19  ;;  %v1109_v21 = vpop.f32.mrb[14].mxu1 }
 0x345   :  { %v735_v22 = vadd.f32 %v1109_v21, %v878_v38  ;;  %v726_v23 = vpop.f32.mrb[15].mxu1  ;;  %v752_v25 = vmax.f32 %v732_v18, 0.0 }
 0x346   :  { %v727_v24 = vadd.f32 %v878_v38, %v726_v23  ;;  %v750_v27 = vmax.f32 %v724_v20, 0.0 }
 0x347   :  { %v753_v26 = vmax.f32 %v735_v22, 0.0 }
 0x348   :  { %v751_v28 = vmax.f32 %v727_v24, 0.0 }
 0x349   :  { %v957_v29 = vpack.c.bf16 %v753_v26, %v752_v25 }
 0x34a   :  { %v952_v30 = vpack.c.bf16 %v751_v28, %v750_v27 }
 0x34b   :  { %965 = vst [vmem:[#allocation14 + $0x38] sm:$0xff] %v957_v29  }
 0x34c   :  { %964 = vst [vmem:[#allocation14 + $0x30] sm:$0xff] %v952_v30  }
 0x34d   :  { %1261 = shalt.err (!%p1258_p0)
}
 0x34e   :  { %s1262_s14 = scalar_lea.hbm %s1460_s8, 1024 }
 0x34f   :  { %p1263_p1 = scmp.ne.s32.totalorder %s1460_s8, %s1262_s14  ;;  %p1266_p2 = scmp.lt.u32.totalorder %s1262_s14, %s1460_s8 }
 0x351   :  { %p1268_p3 = pnand %p1266_p2, %p1263_p1 }
 0x353   :  { %1271 = shalt.err (!%p1268_p3)
}
 0x354   :  { %845 = dma.vmem_to_hbm [thread:$0]  %s840_s11, 1024, %s1460_s8, [#allocation8], %s1281_s19, %s1281_s19, %s1282_s20  }
 0x355   :  { %1278 = dma.done.wait [#allocation8], 1024  }
 0x356   :  { %1279 = vsyncadd [#allocation8], 4294966272 }
 0x357   :  { %849 = vsyncpa [#allocation7], 1 }
 0x358   :  { %850 = vsyncpa [#allocation10], 1 }
 0x359   :  { %851 = vsyncpa [#allocation13], 1 }
 0x35a   :  { %852 = vsyncpa [#allocation8], 1 }

</bundles_post_ra>
